<compile_context>
chip_gen: v5e
topology: v5e:2x2
jax: 0.10.0
libtpu: 0.0.40
codegen_flags: <defaults>
</compile_context>

<pallas_src>
import math
from functools import partial

import jax
import jax.numpy as jnp
from jax.experimental import pallas as pl
from jax.experimental.pallas import tpu as pltpu


def temporal_attention_kernel(
    x_ref,       # (1, S, H)     f32 snapshot features for this batch element
    wqkv_ref,    # (1, H, 3*dh)  per-head fused [Wq/sqrt(dh) | Wk | Wv], compute dtype
    wo_ref,      # (1, dh, H)    per-head rows of the output projection, compute dtype
    bqkv_ref,    # (1, 1, 3*dh)  per-head fused [bq/sqrt(dh) | bk | bv], f32
    bo_ref,      # (1, H)        output bias, f32
    out_ref,     # (1, S, H)     f32; VMEM-resident accumulator across the head axis
    attn_ref,    # (1, 1, S, S)  attention weights for this (batch, head)
    *,
    head_dim: int,
    compute_dtype,
):
    h = pl.program_id(1)
    dh = head_dim

    x = x_ref[0].astype(compute_dtype)                               # (S, H)

    # Per-head fused Q|K|V projection: one (H x 3dh) MXU pass, f32 accumulation.
    qkv = jnp.dot(x, wqkv_ref[0],
                  preferred_element_type=jnp.float32) + bqkv_ref[0]  # (S, 3dh) f32

    q = qkv[:, 0 * dh:1 * dh].astype(compute_dtype)   # already scaled by 1/sqrt(dh)
    k = qkv[:, 1 * dh:2 * dh].astype(compute_dtype)
    v = qkv[:, 2 * dh:3 * dh].astype(compute_dtype)

    # Scores + numerically stable softmax.  Exact reciprocal: the stored
    # attention weights sum to 1 per row (reviewer correctness concern).
    scores = jnp.dot(q, k.T, preferred_element_type=jnp.float32)     # (S, S)
    m = jnp.max(scores, axis=-1, keepdims=True)
    e = jnp.exp(scores - m)
    denom = jnp.sum(e, axis=-1, keepdims=True)
    attn = e * (1.0 / denom)

    # TODO(synk): optional `mask` argument of the PyTorch forward is not
    # plumbed through (the module is exercised with mask=None).

    attn_ref[0, 0] = attn.astype(attn_ref.dtype)

    # Context and this head's contribution to the output projection.
    ctx = jnp.dot(attn.astype(compute_dtype), v,
                  preferred_element_type=jnp.float32)                # (S, dh)
    contrib = jnp.dot(ctx.astype(compute_dtype), wo_ref[0],
                      preferred_element_type=jnp.float32)            # (S, H)

    # concat_h(ctx_h) @ Wo == sum_h ctx_h @ Wo_h: accumulate into the resident
    # output block — no (nh, S, H) intermediate is ever materialized.
    @pl.when(h == 0)
    def _():
        out_ref[0] = (contrib + bo_ref[...]).astype(out_ref.dtype)

    @pl.when(h > 0)
    def _():
        out_ref[0] = out_ref[0] + contrib.astype(out_ref.dtype)


def temporal_attention(x, params, *, num_heads: int,
                       compute_dtype=jnp.bfloat16, attn_dtype=jnp.float32):
    """x: (B, S, H) f32.  Returns (output (B,S,H) f32, attn (B,nh,S,S) attn_dtype)."""
    B, S, H = x.shape
    dh = H // num_heads
    inv_sqrt_dh = 1.0 / math.sqrt(dh)

    # ---- one-time host-side parameter re-layout -----------------------------
    # Fold 1/sqrt(head_dim) into Wq/bq (removes the scores-tensor VPU multiply).
    wq = params["wq"] * inv_sqrt_dh
    bq = params["bq"] * inv_sqrt_dh

    def by_head(w):       # (H, H) -> (nh, H, dh); head h owns output cols [h*dh,(h+1)*dh)
        return w.reshape(H, num_heads, dh).transpose(1, 0, 2)

    def bias_by_head(b):  # (1, H) -> (nh, 1, dh)
        return b[0].reshape(num_heads, 1, dh)

    # Fused per-head [Wq | Wk | Wv]; weights cast once to the MXU compute dtype
    # (bf16 by default), biases kept f32 (added to the f32 accumulator).
    w_qkv = jnp.concatenate(
        [by_head(wq), by_head(params["wk"]), by_head(params["wv"])],
        axis=-1).astype(compute_dtype)                               # (nh, H, 3dh)
    b_qkv = jnp.concatenate(
        [bias_by_head(bq), bias_by_head(params["bk"]), bias_by_head(params["bv"])],
        axis=-1).astype(jnp.float32)                                 # (nh, 1, 3dh)
    wo3 = params["wo"].reshape(num_heads, dh, H).astype(compute_dtype)  # (nh, dh, H)
    bo = params["bo"].astype(jnp.float32)                            # (1, H)

    kernel = partial(temporal_attention_kernel,
                     head_dim=dh, compute_dtype=compute_dtype)

    return pl.pallas_call(
        kernel,
        out_shape=(
            jax.ShapeDtypeStruct((B, S, H), jnp.float32),
            jax.ShapeDtypeStruct((B, num_heads, S, S), attn_dtype),
        ),
        grid_spec=pltpu.PrefetchScalarGridSpec(
            num_scalar_prefetch=0,
            # Batch parallel (megacore on v7x); heads sequential because the
            # output block accumulates across heads.
            grid=(B, num_heads),
            in_specs=[
                pl.BlockSpec((1, S, H), lambda b, h: (b, 0, 0)),       # x (reused across h)
                pl.BlockSpec((1, H, 3 * dh), lambda b, h: (h, 0, 0)),  # per-head QKV weights
                pl.BlockSpec((1, dh, H), lambda b, h: (h, 0, 0)),      # per-head out-proj rows
                pl.BlockSpec((1, 1, 3 * dh), lambda b, h: (h, 0, 0)),  # per-head QKV bias
                pl.BlockSpec((1, H), lambda b, h: (0, 0)),             # out bias
            ],
            out_specs=[
                pl.BlockSpec((1, S, H), lambda b, h: (b, 0, 0)),       # resident accumulator
                pl.BlockSpec((1, 1, S, S), lambda b, h: (b, h, 0, 0)), # per-(b,h) attn tile
            ],
        ),
        compiler_params=pltpu.CompilerParams(
            dimension_semantics=("parallel", "arbitrary"),
            # Production S: also tile q-blocks of attn (grid (B, nh, S//tq)) and
            # raise vmem_limit_bytes (v6e); single-buffer the grid-invariant
            # weight specs (pl.Buffered(1)) on v7x for extra VMEM headroom.
        ),
    )(x, w_qkv, wo3, b_qkv, bo)


def reference(x, params, *, num_heads: int):
    """Pure-JAX reference mirroring the PyTorch forward (HIGHEST precision)."""
    B, S, H = x.shape
    dh = H // num_heads
    hp = jax.lax.Precision.HIGHEST

    def proj(w, b):
        return jnp.dot(x, w, precision=hp) + b[0]

    q = proj(params["wq"], params["bq"]).reshape(B, S, num_heads, dh).transpose(0, 2, 1, 3)
    k = proj(params["wk"], params["bk"]).reshape(B, S, num_heads, dh).transpose(0, 2, 1, 3)
    v = proj(params["wv"], params["bv"]).reshape(B, S, num_heads, dh).transpose(0, 2, 1, 3)

    scores = jnp.einsum("bhqd,bhkd->bhqk", q, k, precision=hp) / math.sqrt(dh)
    attn = jax.nn.softmax(scores, axis=-1)
    ctx = jnp.einsum("bhqk,bhkd->bhqd", attn, v, precision=hp)
    ctx = ctx.transpose(0, 2, 1, 3).reshape(B, S, H)
    out = jnp.dot(ctx, params["wo"], precision=hp) + params["bo"][0]
    return out, attn


def init_params(key, hidden_dim):
    ks = jax.random.split(key, 8)
    scale = 1.0 / math.sqrt(hidden_dim)

    def w(k):
        return jax.random.normal(k, (hidden_dim, hidden_dim), jnp.float32) * scale

    def b(k):
        return jax.random.normal(k, (1, hidden_dim), jnp.float32) * scale

    return {
        "wq": w(ks[0]), "wk": w(ks[1]), "wv": w(ks[2]), "wo": w(ks[3]),
        "bq": b(ks[4]), "bk": b(ks[5]), "bv": b(ks[6]), "bo": b(ks[7]),
    }


if __name__ == "__main__":
    B, S, H, NH = 2, 8, 32, 8   # batch=2, seq=8, hidden=32, num_heads=8 -> head_dim=4

    key = jax.random.PRNGKey(0)
    kx, kp = jax.random.split(key)
    x = jax.random.normal(kx, (B, S, H), jnp.float32)
    params = init_params(kp, H)

    ref_out, ref_attn = reference(x, params, num_heads=NH)

    # f32 compute path. Tolerance absorbs TPU default-precision matmuls in the
    # kernel vs. the HIGHEST-precision reference (both are structurally exact).
    out32, attn32 = temporal_attention(x, params, num_heads=NH,
                                       compute_dtype=jnp.float32,
                                       attn_dtype=jnp.float32)
    out32 = jax.block_until_ready(out32)
    attn32 = jax.block_until_ready(attn32)
    assert jnp.allclose(out32, ref_out, atol=3e-2, rtol=3e-2), "f32 output mismatch"
    assert jnp.allclose(attn32, ref_attn, atol=1e-2, rtol=1e-2), "f32 attn mismatch"

    # bf16 compute path (production default): bf16 MXU matmuls with f32
    # accumulation, attention weights stored in bf16 (halves the dominant HBM
    # write traffic at production S).  Tolerance accounts for bf16 mantissa.
    out16, attn16 = temporal_attention(x, params, num_heads=NH,
                                       compute_dtype=jnp.bfloat16,
                                       attn_dtype=jnp.bfloat16)
    out16 = jax.block_until_ready(out16)
    attn16 = jax.block_until_ready(attn16)
    assert jnp.allclose(out16, ref_out, atol=5e-2, rtol=5e-2), "bf16 output mismatch"
    assert jnp.allclose(attn16.astype(jnp.float32), ref_attn,
                        atol=2e-2, rtol=2e-2), "bf16 attn mismatch"

    print("KERNEL_OK")
</pallas_src>

<mosaic_0001>
module attributes {stable_mosaic.version = 11 : i64} {
  func.func @temporal_attention_kernel(%arg0: i32, %arg1: i32, %arg2: memref<1x8x32xf32, #tpu.memory_space<vmem>>, %arg3: memref<1x32x12xf32, #tpu.memory_space<vmem>>, %arg4: memref<1x4x32xf32, #tpu.memory_space<vmem>>, %arg5: memref<1x1x12xf32, #tpu.memory_space<vmem>>, %arg6: memref<1x32xf32, #tpu.memory_space<vmem>>, %arg7: memref<1x8x32xf32, #tpu.memory_space<vmem>>, %arg8: memref<1x1x8x8xf32, #tpu.memory_space<vmem>>) attributes {dimension_semantics = [#tpu.dimension_semantics<parallel>, #tpu.dimension_semantics<arbitrary>], iteration_bounds = array<i64: 2, 8>, scalar_prefetch = 0 : i64, scratch_operands = 0 : i64, tpu.core_type = #tpu.core_type<tc>, window_params = [{transform_indices = @transform_0, window_bounds = array<i64: 1, 8, 32>}, {transform_indices = @transform_1, window_bounds = array<i64: 1, 32, 12>}, {transform_indices = @transform_2, window_bounds = array<i64: 1, 4, 32>}, {transform_indices = @transform_3, window_bounds = array<i64: 1, 1, 12>}, {pipeline_mode = #tpu.pipeline_mode<synchronous>, transform_indices = @transform_4, window_bounds = array<i64: 1, 32>}, {transform_indices = @transform_5, window_bounds = array<i64: 1, 8, 32>}, {transform_indices = @transform_6, window_bounds = array<i64: 1, 1, 8, 8>}]} {
    %c0 = arith.constant 0 : index
    %c0_0 = arith.constant 0 : index
    %c0_1 = arith.constant 0 : index
    %0 = vector.load %arg2[%c0, %c0_0, %c0_1] : memref<1x8x32xf32, #tpu.memory_space<vmem>>, vector<1x8x32xf32>
    %1 = vector.shape_cast %0 : vector<1x8x32xf32> to vector<8x32xf32>
    %c0_2 = arith.constant 0 : index
    %c0_3 = arith.constant 0 : index
    %c0_4 = arith.constant 0 : index
    %2 = vector.load %arg3[%c0_2, %c0_3, %c0_4] : memref<1x32x12xf32, #tpu.memory_space<vmem>>, vector<1x32x12xf32>
    %3 = vector.shape_cast %2 : vector<1x32x12xf32> to vector<32x12xf32>
    %cst = arith.constant dense<0.000000e+00> : vector<8x12xf32>
    %4 = tpu.matmul %1, %3, %cst {dimension_numbers = #tpu.dot_dimension_numbers<[1], [0], [0], [1], [0, 0, 1, 1], [], []>} : vector<8x32xf32>, vector<32x12xf32>, vector<8x12xf32> -> vector<8x12xf32>
    %c0_5 = arith.constant 0 : index
    %c0_6 = arith.constant 0 : index
    %c0_7 = arith.constant 0 : index
    %5 = vector.load %arg5[%c0_5, %c0_6, %c0_7] : memref<1x1x12xf32, #tpu.memory_space<vmem>>, vector<1x1x12xf32>
    %6 = vector.shape_cast %5 : vector<1x1x12xf32> to vector<1x12xf32>
    %7 = vector.broadcast %6 : vector<1x12xf32> to vector<8x12xf32>
    %8 = arith.addf %4, %7 : vector<8x12xf32>
    %9 = vector.extract_strided_slice %8 {offsets = [0, 0], sizes = [8, 4], strides = [1, 1]} : vector<8x12xf32> to vector<8x4xf32>
    %10 = vector.extract_strided_slice %8 {offsets = [0, 4], sizes = [8, 4], strides = [1, 1]} : vector<8x12xf32> to vector<8x4xf32>
    %11 = vector.extract_strided_slice %8 {offsets = [0, 8], sizes = [8, 4], strides = [1, 1]} : vector<8x12xf32> to vector<8x4xf32>
    %12 = tpu.transpose %10, [1, 0] : vector<8x4xf32> -> vector<4x8xf32>
    %cst_8 = arith.constant dense<0.000000e+00> : vector<8x8xf32>
    %13 = tpu.matmul %9, %12, %cst_8 {dimension_numbers = #tpu.dot_dimension_numbers<[1], [0], [0], [1], [0, 0, 1, 1], [], []>} : vector<8x4xf32>, vector<4x8xf32>, vector<8x8xf32> -> vector<8x8xf32>
    %cst_9 = arith.constant dense<0xFF800000> : vector<8xf32>
    %14 = vector.multi_reduction <maximumf>, %13, %cst_9 [1] : vector<8x8xf32> to vector<8xf32>
    %15 = vector.shape_cast %14 : vector<8xf32> to vector<8x1xf32>
    %16 = vector.broadcast %15 : vector<8x1xf32> to vector<8x8xf32>
    %17 = arith.subf %13, %16 : vector<8x8xf32>
    %18 = math.exp %17 : vector<8x8xf32>
    %cst_10 = arith.constant dense<0.000000e+00> : vector<8xf32>
    %19 = vector.multi_reduction <add>, %18, %cst_10 [1] : vector<8x8xf32> to vector<8xf32>
    %20 = vector.shape_cast %19 : vector<8xf32> to vector<8x1xf32>
    %cst_11 = arith.constant 1.000000e+00 : f32
    %21 = vector.broadcast %cst_11 : f32 to vector<8x1xf32>
    %22 = arith.divf %21, %20 : vector<8x1xf32>
    %23 = vector.broadcast %22 : vector<8x1xf32> to vector<8x8xf32>
    %24 = arith.mulf %18, %23 : vector<8x8xf32>
    %c0_12 = arith.constant 0 : index
    %c0_13 = arith.constant 0 : index
    %c0_14 = arith.constant 0 : index
    %c0_15 = arith.constant 0 : index
    %25 = vector.load %arg8[%c0_12, %c0_13, %c0_14, %c0_15] : memref<1x1x8x8xf32, #tpu.memory_space<vmem>>, vector<1x1x8x8xf32>
    %26 = vector.shape_cast %25 : vector<1x1x8x8xf32> to vector<8x8xf32>
    %27 = vector.shape_cast %24 : vector<8x8xf32> to vector<1x1x8x8xf32>
    tpu.vector_store %arg8[%c0_12, %c0_13, %c0_14, %c0_15], %27 {strides = array<i32>} : memref<1x1x8x8xf32, #tpu.memory_space<vmem>>, vector<1x1x8x8xf32>,
    %cst_16 = arith.constant dense<0.000000e+00> : vector<8x4xf32>
    %28 = tpu.matmul %24, %11, %cst_16 {dimension_numbers = #tpu.dot_dimension_numbers<[1], [0], [0], [1], [0, 0, 1, 1], [], []>} : vector<8x8xf32>, vector<8x4xf32>, vector<8x4xf32> -> vector<8x4xf32>
    %c0_17 = arith.constant 0 : index
    %c0_18 = arith.constant 0 : index
    %c0_19 = arith.constant 0 : index
    %29 = vector.load %arg4[%c0_17, %c0_18, %c0_19] : memref<1x4x32xf32, #tpu.memory_space<vmem>>, vector<1x4x32xf32>
    %30 = vector.shape_cast %29 : vector<1x4x32xf32> to vector<4x32xf32>
    %cst_20 = arith.constant dense<0.000000e+00> : vector<8x32xf32>
    %31 = tpu.matmul %28, %30, %cst_20 {dimension_numbers = #tpu.dot_dimension_numbers<[1], [0], [0], [1], [0, 0, 1, 1], [], []>} : vector<8x4xf32>, vector<4x32xf32>, vector<8x32xf32> -> vector<8x32xf32>
    %c0_i32 = arith.constant 0 : i32
    %32 = arith.cmpi eq, %arg1, %c0_i32 : i32
    %33 = arith.extui %32 : i1 to i32
    %c0_i32_21 = arith.constant 0 : i32
    %34 = arith.cmpi ne, %33, %c0_i32_21 : i32
    scf.if %34 {
      %c0_24 = arith.constant 0 : index
      %c0_25 = arith.constant 0 : index
      %38 = vector.load %arg6[%c0_24, %c0_25] : memref<1x32xf32, #tpu.memory_space<vmem>>, vector<1x32xf32>
      %39 = vector.broadcast %38 : vector<1x32xf32> to vector<8x32xf32>
      %40 = arith.addf %31, %39 : vector<8x32xf32>
      %c0_26 = arith.constant 0 : index
      %c0_27 = arith.constant 0 : index
      %c0_28 = arith.constant 0 : index
      %41 = vector.load %arg7[%c0_26, %c0_27, %c0_28] : memref<1x8x32xf32, #tpu.memory_space<vmem>>, vector<1x8x32xf32>
      %42 = vector.shape_cast %41 : vector<1x8x32xf32> to vector<8x32xf32>
      %43 = vector.shape_cast %40 : vector<8x32xf32> to vector<1x8x32xf32>
      tpu.vector_store %arg7[%c0_26, %c0_27, %c0_28], %43 {strides = array<i32>} : memref<1x8x32xf32, #tpu.memory_space<vmem>>, vector<1x8x32xf32>,
    } else {
    }
    %c0_i32_22 = arith.constant 0 : i32
    %35 = arith.cmpi sgt, %arg1, %c0_i32_22 : i32
    %36 = arith.extui %35 : i1 to i32
    %c0_i32_23 = arith.constant 0 : i32
    %37 = arith.cmpi ne, %36, %c0_i32_23 : i32
    scf.if %37 {
      %c0_24 = arith.constant 0 : index
      %c0_25 = arith.constant 0 : index
      %c0_26 = arith.constant 0 : index
      %38 = vector.load %arg7[%c0_24, %c0_25, %c0_26] : memref<1x8x32xf32, #tpu.memory_space<vmem>>, vector<1x8x32xf32>
      %39 = vector.shape_cast %38 : vector<1x8x32xf32> to vector<8x32xf32>
      %40 = arith.addf %39, %31 : vector<8x32xf32>
      %c0_27 = arith.constant 0 : index
      %c0_28 = arith.constant 0 : index
      %c0_29 = arith.constant 0 : index
      %41 = vector.load %arg7[%c0_27, %c0_28, %c0_29] : memref<1x8x32xf32, #tpu.memory_space<vmem>>, vector<1x8x32xf32>
      %42 = vector.shape_cast %41 : vector<1x8x32xf32> to vector<8x32xf32>
      %43 = vector.shape_cast %40 : vector<8x32xf32> to vector<1x8x32xf32>
      tpu.vector_store %arg7[%c0_27, %c0_28, %c0_29], %43 {strides = array<i32>} : memref<1x8x32xf32, #tpu.memory_space<vmem>>, vector<1x8x32xf32>,
    } else {
    }
    return
  }
  func.func @transform_0(%arg0: i32, %arg1: i32) -> (i32, i32, i32) {
    %c0_i32 = arith.constant 0 : i32
    %c0_i32_0 = arith.constant 0 : i32
    %c0_i32_1 = arith.constant 0 : i32
    return %arg0, %c0_i32, %c0_i32_0 : i32, i32, i32
  }
  func.func @transform_1(%arg0: i32, %arg1: i32) -> (i32, i32, i32) {
    %c0_i32 = arith.constant 0 : i32
    %c0_i32_0 = arith.constant 0 : i32
    %c0_i32_1 = arith.constant 0 : i32
    return %arg1, %c0_i32, %c0_i32_0 : i32, i32, i32
  }
  func.func @transform_2(%arg0: i32, %arg1: i32) -> (i32, i32, i32) {
    %c0_i32 = arith.constant 0 : i32
    %c0_i32_0 = arith.constant 0 : i32
    %c0_i32_1 = arith.constant 0 : i32
    return %arg1, %c0_i32, %c0_i32_0 : i32, i32, i32
  }
  func.func @transform_3(%arg0: i32, %arg1: i32) -> (i32, i32, i32) {
    %c0_i32 = arith.constant 0 : i32
    %c0_i32_0 = arith.constant 0 : i32
    %c0_i32_1 = arith.constant 0 : i32
    return %arg1, %c0_i32, %c0_i32_0 : i32, i32, i32
  }
  func.func @transform_4(%arg0: i32, %arg1: i32) -> (i32, i32) {
    %c0_i32 = arith.constant 0 : i32
    %c0_i32_0 = arith.constant 0 : i32
    %c0_i32_1 = arith.constant 0 : i32
    return %c0_i32, %c0_i32_0 : i32, i32
  }
  func.func @transform_5(%arg0: i32, %arg1: i32) -> (i32, i32, i32) {
    %c0_i32 = arith.constant 0 : i32
    %c0_i32_0 = arith.constant 0 : i32
    %c0_i32_1 = arith.constant 0 : i32
    return %arg0, %c0_i32, %c0_i32_0 : i32, i32, i32
  }
  func.func @transform_6(%arg0: i32, %arg1: i32) -> (i32, i32, i32, i32) {
    %c0_i32 = arith.constant 0 : i32
    %c0_i32_0 = arith.constant 0 : i32
    %c0_i32_1 = arith.constant 0 : i32
    return %arg0, %arg1, %c0_i32, %c0_i32_0 : i32, i32, i32, i32
  }
}

</mosaic_0001>

<bundles_post_ra>
// kernel: tpu_custom_call.1
= control target key start
LH: loop header
LB: loop body
LE: loop exit
PB: predicated region body
PF: predicated region fallthrough
CT: control target
= control target key end

     0   :  { %s1223_s0 = inlined_call_operand.vmem [shape: f32[2,8,32], index: 0, kind: input, shape index: {}]   ;;  %s1224_s1 = inlined_call_operand.vmem [shape: f32[8,32,12], index: 1, kind: input, shape index: {}]   ;;  %s1225_s2 = inlined_call_operand.vmem [shape: f32[8,4,32], index: 2, kind: input, shape index: {}]   ;;  %s1226_s3 = inlined_call_operand.vmem [shape: f32[8,1,12], index: 3, kind: input, shape index: {}]   ;;  %s1227_s4 = inlined_call_operand.vmem [shape: f32[1,32], index: 4, kind: input, shape index: {}]   ;;  %s1228_s5 = inlined_call_operand.hbm [shape: f32[2,8,32], index: 5, kind: output, shape index: {0}]   ;;  %s1229_s6 = inlined_call_operand.hbm [shape: f32[2,8,8,8], index: 6, kind: output, shape index: {1}]  }
   0x1   :  { %1240 = sst [smem:[#allocation17_spill]] %s1223_s0 }
   0x2   :  { %12 = vsyncpa [#allocation3], 0 }
   0x3   :  { %14 = vsyncpa [#allocation3 + $0x1], 0 }
   0x4   :  { %15 = vsyncpa [#allocation5], 0 }
   0x5   :  { %17 = vsyncpa [#allocation5 + $0x1], 0  ;;  %s981_s21 = smov 0   ;;  %s983_s22 = smov 0  }
   0x6   :  { %s985_s23 = smov 0   ;;  %s987_s24 = smov 0  }
   0x7   :  { %s989_s25 = smov 0   ;;  %s991_s26 = smov 0  }
   0x8   :  { %s993_s27 = smov 0   ;;  %s995_s28 = smov 0  }
   0x9   :  { %s997_s29 = smov 0   ;;  %s999_s30 = smov 0  }
   0xa   :  { %s1001_s7 = smov 0  }
   0xb LB: > { %1241 = sst [smem:[#allocation8_spill]] %s910_s23  ;;  %s657_s8 = sadd.s32 4294967295, %s942_s7   ;;  %s942_s7 = sphi %s1001_s7, %s23_s7   ;;  %s938_s30 = sphi %s999_s30, %s1268_s30   ;;  %s934_s29 = sphi %s997_s29, %s1267_s29   ;;  %s930_s28 = sphi %s995_s28, %s1266_s28   ;;  %s926_s27 = sphi %s993_s27, %s1265_s27   ;;  %s922_s26 = sphi %s991_s26, %s1264_s26   ;;  %s918_s25 = sphi %s989_s25, %s1272_s25   ;;  %s914_s24 = sphi %s987_s24, %s1271_s24   ;;  %s910_s23 = sphi %s985_s23, %s1262_s23   ;;  %s906_s22 = sphi %s983_s22, %s1270_s22   ;;  %s902_s21 = sphi %s981_s21, %s1269_s21  }
   0xc   : > { %1242 = sst [smem:[#allocation9_spill]] %s922_s26  ;;  %s658_s9 = sadd.s32 4294967294, %s942_s7  }
   0xd   : > { %1243 = sst [smem:[#allocation10_spill]] %s934_s29  ;;  %s32_s10 = sadd.s32 1, %s934_s29 }
   0xe   : > { %1244 = sst [smem:[#allocation11_spill]] %s938_s30  ;;  %s35_s11 = sadd.s32 1, %s938_s30 }
   0xf   : > { %p33_p0 = scmp.ge.s32.totalorder %s32_s10, 8  ;;  %s167_s12 = sadd.s32 1, %s922_s26 }
  0x10   : > { %p177_p1 = scmp.ne.s32.totalorder %s922_s26, %s918_s25  ;;  %p1043_p2 = scmp.eq.s32.totalorder %s657_s8, 15 }
  0x11   : > { %s1274_s10 = smov (%p33_p0, %s32_s10), 0  ;;  %s1276_s11 = smov (!%p33_p0, %s35_s11), %s938_s30 }
  0x12   : > { %1246 = sst [smem:[#allocation12_spill]] %s1274_s10  ;;  %p1052_p3 = por %p1043_p2, %p177_p1 }
  0x13   : > { %p183_p4 = scmp.ne.s32.totalorder %s918_s25, %s914_s24  ;;  %p37_p5 = scmp.ge.s32.totalorder %s1276_s11, 2 }
  0x14   : > { %p1058_p6 = scmp.eq.s32.totalorder %s658_s9, 15  ;;  %s191_s16 = ssub.s32 %s934_s29, %s1274_s10 }
  0x15   : > { %s195_s17 = sadd.s32 1, %s910_s23  ;;  %s1278_s11 = smov (%p37_p5, %s1276_s11), 0 }
  0x16   : > { %1249 = sst [smem:[#allocation13_spill]] %s1278_s11  ;;  %p1069_p7 = por %p1058_p6, %p183_p4 }
  0x17   : > { %p205_p8 = scmp.ne.s32.totalorder %s910_s23, %s906_s22  ;;  %s164_s19 = ssub.s32 %s938_s30, %s1278_s11 }
  0x18   : > { %p211_p9 = scmp.ne.s32.totalorder %s906_s22, %s902_s21  ;;  %p165_p10 = scmp.eq.s32.totalorder %s164_s19, 0 }
  0x19   : > { %s192_s20 = sor.u32 %s191_s16, %s164_s19  ;;  %p1081_p12 = por %p205_p8, %p1043_p2 }
  0x1a   : > { %p193_p11 = scmp.eq.s32.totalorder %s192_s20, 0  ;;  %p1093_p13 = por %p211_p9, %p1058_p6 }
  0x1b   : > { %s1086_s9 = scalar_select %p165_p10, %s922_s26, %s167_s12  }
  0x1c   : > { %s1089_s10 = scalar_select %p193_p11, %s910_s23, %s195_s17  }
  0x1d   : > { %1252 = sst [smem:[#allocation14_spill]] %s1086_s9  ;;  %p661_p0 = scmp.ge.s32.totalorder %s942_s7, 1 }
  0x1e   : > { %1253 = sst [smem:[#allocation15_spill]] %s1089_s10  ;;  %p261_p1 = scmp.lt.s32.totalorder %s942_s7, 17 }
  0x1f   : > { %s1254_s29 = scalar_select %p1093_p13, 1, 0 }
  0x20   : > { %p262_p4 = pnand %p661_p0, %p261_p1 }
  0x21   : > { %1255 = sst [smem:[#allocation16_spill]] %s1254_s29  ;;  %s1235_s13 = sand.u32 (!%p262_p4), 1, %s918_s25  }
  0x22   : > { %265 = sbr.rel (%p262_p4) target bundleno = 1003 (0x3eb), region = 40  ;;  %p311_p2 = scmp.lt.s32.totalorder (!%p262_p4), %s926_s27, 7 }
  0x23   : > { %s1103_s12 = sshll.u32 (!%p262_p4), %s1235_s13, 3  ;;  %p307_p5 = scmp.lt.s32.totalorder (!%p262_p4), %s930_s28, 1 }
  0x24   : > { %s1256_s0 = sld [smem:[#allocation17_spill]] (!%p262_p4)  ;;  %s944_s30 = smov (!%p262_p4), 124  }
  0x25   : > { %s945_s23 = smov (!%p262_p4), 120   ;;  %p674_p6 = scmp.ne.s32.totalorder (!%p262_p4), %s926_s27, 0 }
  0x27   : > { %s1107_s15 = scalar_select %p311_p2, %s926_s27, 7  ;;  %vm332_vm0 = vcmask 261120   ;;  %vm359_vm1 = vcmask 31744   ;;  %vm384_vm2 = vcmask 64512   ;;  %vm441_vm7 = vcmask 1043456  }
  0x28   : > { %s308_s16 = scalar_select %p307_p5, %s930_s28, 1 }
  0x29   : > { %s683_s17 = sshll.u32 %s1107_s15, 5  ;;  %s322_s11 = scalar_lea.vmem %s1226_s3, %s1107_s15 }
  0x2a   : > { %s315_s26 = scalar_lea.vmem %s1224_s1, %s683_s17  ;;  %s664_s10 = sshll.u32 %s308_s16, 3  ;;  %v786_v5 = vld [vmem:[%s322_s11] ss:$0 sm:$0xff] }
  0x2b   : > { %v327_v0 = vld [vmem:[%s315_s26 + $0x18] sm:$0xff]  ;;  %v326_v1 = vld [vmem:[%s315_s26 + $0x10] sm:$0xff]  ;;  %v325_v2 = vld [vmem:[%s315_s26 + $0x8] sm:$0xff]  ;;  %s310_s29 = scalar_lea.vmem %s1256_s0, %s664_s10  ;;  %s667_s11 = sshll.u32 %s1107_s15, 2 }
  0x2c   : > { %348 = vmatpush.msra.mxu0 %v327_v0  ;;  %v324_v3 = vld [vmem:[%s315_s26] sm:$0xff]  ;;  %s1238_s26 = sand.u32 1, %s906_s22   ;;  %s319_s16 = scalar_lea.vmem %s1225_s2, %s667_s11 }
  0x2d   : > { %v323_v4 = vld [vmem:[%s310_s29] sm:$0xff]  ;;  %s1129_s29 = sshll.u32 %s1238_s26, 3  ;;  %s299_s17 = scalar_lea.vmem [#allocation2], %s1103_s12 }
  0x2e   : > { %349 = vmatpush.msra.mxu0 %v326_v1  ;;  %s1239_s10 = scalar_lea.vmem [#allocation4], %s1129_s29  ;;  %v437_v29 = vld [vmem:[%s319_s16] sm:$0xf] }
  0x2f   : > { %672 = vmatpush.msk.msra.mxu3 %vm441_vm7, %v437_v29 }
  0x30   : > { %350 = vmatpush.msra.mxu0 %v325_v2 }
  0x32   : > { %351 = vmatpush.msra.mxu0 %v324_v3 }
  0x33   : > { %668 = vmatmul.msk.f32.vlgmr.msra.gmra.mxu0 %vm332_vm0, %v323_v4 }
  0xb0   : > { %v353_v6 = vpop.f32.mrf.mxu0 }
  0xb1   : > { %v354_v7 = vadd.f32 %v786_v5, %v353_v6 }
  0xb3   : > { %357 = vrot.lane.b32.xlu0 %v354_v7, %s944_s30 }
 0x125   : > { %v358_v8 = vpop.permute.xlu0 %357 }
 0x126   : > { %669 = vmatpush.xpose.msk.msra.mxu1 %vm359_vm1, %v358_v8 }
 0x129   : > { %670 = vmatmul.msk.f32.vlgmr.msra.gmra.mxu1 %vm359_vm1, %v354_v7 }
 0x1a6   : > { %v381_v9 = vpop.f32.mrf.mxu1 }
 0x1a7   : > { %v385_v10 = vsel %vm384_vm2, %v381_v9, -inf }
 0x1a8   : > { %386 = vmax.xlane.f32.xlu0 %v385_v10 }
 0x21b   : > { %v387_v11 = vpop.xlane.xlu0 %386 }
 0x21c   : > { %v388_v12 = vsub.f32 %v381_v9, %v387_v11 }
 0x21e   : > { %v389_v13 = vmul.f32 1.442695, %v388_v12 }
 0x220   : > { %787 = vpow2.f32 %v389_v13 }
 0x226   : > { %v788_v14 = vpop.eup %787 }
 0x227   : > { %v391_v15 = vsel %vm384_vm2, %v788_v14, 0.0 }
 0x228   : > { %392 = vadd.xlane.f32.xlu1 %v391_v15 }
 0x241   : > { %411 = vrot.lane.b32.xlu1 %v354_v7, %s945_s23 }
 0x29b   : > { %v393_v16 = vpop.xlane.xlu1 %392 }
 0x29c   : > { %789 = vrcp.f32 %v393_v16  ;;  %v405_v20 = vand.u32 2147483648, %v393_v16  ;;  %v403_v22 = vand.u32 2147483647, %v393_v16  ;;  %vm399_vm4 = vweird.f32 %v393_v16 }
 0x29e   : > { %v406_v24 = vor.u32 1.1754944e-38, %v405_v20  ;;  %vm404_vm6 = vcmp.eq.f32.partialorder %v403_v22, 8.507059e+37 }
 0x2a2   : > { %v790_v17 = vpop.eup %789 }
 0x2a3   : > { %v395_v18 = vmul.f32 %v790_v17, %v393_v16  ;;  %vm400_vm3 = vweird.f32 %v790_v17 }
 0x2a4   : > { %vm401_vm5 = vmor %vm399_vm4, %vm400_vm3 }
 0x2a5   : > { %v396_v19 = vsub.f32 1.0, %v395_v18 }
 0x2a7   : > { %v397_v21 = vmul.f32 %v790_v17, %v396_v19 }
 0x2a9   : > { %v398_v23 = vadd.f32 %v790_v17, %v397_v21 }
 0x2ab   : > { %v402_v25 = vsel %vm401_vm5, %v790_v17, %v398_v23 }
 0x2ac   : > { %v407_v26 = vsel %vm404_vm6, %v406_v24, %v402_v25 }
 0x2ad   : > { %v409_v27 = vmul.f32 %v788_v14, %v407_v26 }
 0x2af   : > { %410 = vst.msk [vmem:[%s1239_s10] sm:$0xff] %vm384_vm2, %v409_v27 }
 0x2b3   : > { %v412_v28 = vpop.permute.xlu1 %411 }
 0x2b4   : > { %432 = vmatpush.msra.mxu2 %v412_v28 }
 0x2b5   : > { %671 = vmatmul.msk.f32.vlgmr.msra.gmra.mxu2 %vm384_vm2, %v409_v27 }
 0x338   : > { %v434_v30 = vpop.f32.mrf.mxu2 }
 0x339   : > { %673 = vmatmul.msk.f32.vlgmr.msra.gmra.mxu3 %vm359_vm1, %v434_v30 }
 0x3b8   : > { %468 = sbr.rel (%p674_p6) target bundleno = 961 (0x3c1), region = 44 }
 0x3bc   : > { %v462_v31 = vpop.f32.mrf.mxu3 }
 0x3bd   : > { %v791_v32 = vld [vmem:[%s1227_s4] ss:$0 sm:$0xff] }
 0x3be   : > { %v473_v33 = vadd.f32 %v791_v32, %v462_v31 }
 0x3c0   : > { %474 = vst.msk [vmem:[%s299_s17] sm:$0xff] %vm332_vm0, %v473_v33 }
 0x3c1 PF: > { %p675_p8 = scmp.le.s32.totalorder %s926_s27, 0 }
 0x3c3   : > { %478 = sbr.rel (%p675_p8) target bundleno = 972 (0x3cc), region = 48 }
 0x3c8   : > { %v479_v34 = vld [vmem:[%s299_s17] sm:$0xff] }
 0x3c9   : > { %v480_v35 = vadd.f32 %v479_v34, %v462_v31 }
 0x3cb   : > { %481 = vst.msk [vmem:[%s299_s17] sm:$0xff] %vm332_vm0, %v480_v35 }
 0x3cc PF: > { %s678_s12 = sshll.u32 %s930_s28, 3  ;;  %s500_s11 = sshll.u32 %s299_s17, 4  ;;  %s501_s11 = int_to_ptr.vmem [resolvable:$true] %s500_s11 }
 0x3cd   : > { %s498_s23 = scalar_lea.hbm %s1228_s5, %s678_s12  ;;  %s1257_s13 = sand.u32 1, %s918_s25  }
 0x3ce   : > { %s502_s9 = sshll.u32 %s498_s23, 4  ;;  %s483_s16 = scalar_lea.sflag [#allocation3], %s1257_s13  ;;  %s503_s9 = int_to_ptr.hbm [resolvable:$true] %s502_s9 }
 0x3cf   : > { %s806_s19 = sshra.s32 %s503_s9, 4  ;;  %s812_s28 = scalar_lea.hbm %s1228_s5, 16  ;;  %s807_s19 = int_to_ptr.hbm [resolvable:$true] %s806_s19 }
 0x3d0   : > { %s808_s20 = scalar_lea.hbm %s807_s19, 8  ;;  %p813_p0 = scmp.lt.s32.totalorder %s807_s19, %s1228_s5 }
 0x3d1   : > { %p809_p9 = scmp.ne.s32.totalorder %s807_s19, %s808_s20  ;;  %p814_p1 = scmp.lt.s32.totalorder %s812_s28, %s808_s20 }
 0x3d3   : > { %p810_p10 = pnand %p809_p9, %p1052_p3  ;;  %p815_p4 = por %p814_p1, %p813_p0 }
 0x3d5   : > { %p811_p11 = pneg %p810_p10 }
 0x3d7   : > { %p816_p2 = pnand %p815_p4, %p811_p11 }
 0x3d9   : > { %819 = shalt.err (!%p816_p2)
}
 0x3da   : > { %684 = dma.vmem_to_hbm [thread:$0]  (%p1052_p3), %s501_s11, 128, %s503_s9, %s483_s16  }
 0x3db   : > { %s512_s17 = sadd.s32 %s926_s27, %s678_s12  ;;  %s1258_s30 = scalar_lea.vmem [#allocation4], %s1129_s29 }
 0x3dc   : > { %s516_s23 = sshll.u32 %s1258_s30, 4  ;;  %s680_s26 = sshll.u32 %s512_s17, 3  ;;  %s517_s23 = int_to_ptr.vmem [resolvable:$true] %s516_s23 }
 0x3dd   : > { %s514_s0 = scalar_lea.hbm %s1229_s6, %s680_s26  ;;  %s1259_s20 = sand.u32 1, %s906_s22  }
 0x3de   : > { %s518_s19 = sshll.u32 %s514_s0, 4  ;;  %s488_s28 = scalar_lea.sflag [#allocation5], %s1259_s20  ;;  %s519_s19 = int_to_ptr.hbm [resolvable:$true] %s518_s19 }
 0x3df   : > { %s834_s15 = sshra.s32 %s519_s19, 4  ;;  %s840_s12 = scalar_lea.hbm %s1229_s6, 128  ;;  %s835_s15 = int_to_ptr.hbm [resolvable:$true] %s834_s15 }
 0x3e0   : > { %s836_s14 = scalar_lea.hbm %s835_s15, 8  ;;  %p841_p8 = scmp.lt.s32.totalorder %s835_s15, %s1229_s6 }
 0x3e1   : > { %p837_p5 = scmp.ne.s32.totalorder %s835_s15, %s836_s14  ;;  %p842_p9 = scmp.lt.s32.totalorder %s840_s12, %s836_s14 }
 0x3e3   : > { %p838_p6 = pnand %p837_p5, %p1081_p12  ;;  %p843_p10 = por %p842_p9, %p841_p8 }
 0x3e5   : > { %p839_p3 = pneg %p838_p6 }
 0x3e7   : > { %p844_p11 = pnand %p843_p10, %p839_p3 }
 0x3e9   : > { %847 = shalt.err (!%p844_p11)
}
 0x3ea   : > { %685 = dma.vmem_to_hbm [thread:$0]  (%p1081_p12), %s517_s23, 128, %s519_s19, %s488_s28  }
 0x3eb PF: > { %p695_p0 = scmp.ge.s32.totalorder %s942_s7, 2  ;;  %s530_s16 = sand.u32 1, %s914_s24  }
 0x3ec   : > { %s531_s17 = scalar_lea.sflag [#allocation3], %s530_s16 }
 0x3ed   : > { %p689_p1 = pnand %p695_p0, %p1069_p7 }
 0x3ef   : > { %p690_p4 = pneg %p689_p1 }
 0x3f1   : > { %893 = dma.done.wait (%p690_p4), %s531_s17, 128  }
 0x3f2   : > { %895 = vsyncadd (%p690_p4), %s531_s17, 4294967168  ;;  %s540_s26 = sand.u32 1, %s902_s21   ;;  %p692_p2 = pnand %p695_p0, %p1093_p13 }
 0x3f3   : > { %s541_s8 = scalar_lea.sflag [#allocation5], %s540_s26 }
 0x3f4   : > { %p693_p5 = pneg %p692_p2 }
 0x3f6   : > { %897 = dma.done.wait (%p693_p5), %s541_s8, 128  }
 0x3f7   : > { %899 = vsyncadd (%p693_p5), %s541_s8, 4294967168  ;;  %s23_s7 = sadd.s32 1, %s942_s7   ;;  %s1261_s24 = sld [smem:[#allocation8_spill]] }
 0x3f8   : > { %p20_p12 = scmp.ge.s32.totalorder %s23_s7, 18   ;;  %s1262_s23 = sld [smem:[#allocation15_spill]] }
 0x3f9   : > { %s1263_s18 = sld [smem:[#allocation9_spill]]  ;;  %s1269_s21 = smov %s906_s22 }
 0x3fa   : > { %s1264_s26 = sld [smem:[#allocation14_spill]] }
 0x3fb   : > { %s1265_s27 = sld [smem:[#allocation10_spill]]  ;;  %22 = sbr.rel (!%p20_p12) target bundleno = 11 (0xb), region = 109 }
 0x3fc   : > { %s1266_s28 = sld [smem:[#allocation11_spill]] }
 0x3fd   : > { %s1267_s29 = sld [smem:[#allocation12_spill]]  ;;  %s1270_s22 = smov %s1261_s24 }
 0x3fe   : > { %s1268_s30 = sld [smem:[#allocation13_spill]]  ;;  %s1271_s24 = smov %s918_s25 }
 0x3ff   : > { %s1272_s25 = smov %s1263_s18 }
 0x400   :  { %547 = vsyncpa [#allocation3], 1 }
 0x401   :  { %549 = vsyncpa [#allocation3 + $0x1], 1 }
 0x402   :  { %550 = vsyncpa [#allocation5], 1 }
 0x403   :  { %552 = vsyncpa [#allocation5 + $0x1], 1 }

</bundles_post_ra>
